<compile_context>
chip_gen: v6e
topology: v6e:2x2x1
jax: 0.10.0
libtpu: 0.0.40
codegen_flags: <defaults>
</compile_context>

<pallas_src>
import jax
import jax.numpy as jnp
from jax.experimental import pallas as pl
from jax.experimental.pallas import tpu as pltpu


# --------------------------------------------------------------------------------------
# Kernel 1: fused encoder hot path
#   x @ Wf + bf -> relu -> feat ; sum(feat * wp, lanes) + bp -> sigmoid -> pred
#   both written into one combined (tile_m, Cf+1) output block.
# --------------------------------------------------------------------------------------
def _encoder_kernel(x_ref, wf_ref, bf_ref, wpt_ref, bp_ref, out_ref):
    f = jnp.maximum(
        jnp.dot(x_ref[...], wf_ref[...], preferred_element_type=jnp.float32)
        + bf_ref[...],
        0.0,
    )
    # pred head: VPU multiply + XLU lane-reduce instead of an N=1 MXU matmul.
    p = jax.nn.sigmoid(
        jnp.sum(f * wpt_ref[...], axis=-1, keepdims=True) + bp_ref[0, 0]
    )
    cf = f.shape[1]
    out_ref[:, :cf] = f
    out_ref[:, cf:] = p


def encoder_forward(x_nchw, params, tile_m=None):
    """Returns (pred2d (M,1), feat2d (M,Cf)) in flattened channels-last layout."""
    B, Cin, H, W = x_nchw.shape
    Cf = params["w_feat"].shape[1]
    M = B * H * W
    x2d = jnp.transpose(x_nchw, (0, 2, 3, 1)).reshape(M, Cin)

    if tile_m is None:
        # ~half the rows per tile (>= 2 grid steps for v7x's two TCs), multiple of 8,
        # capped at 1024 rows.
        half = max(M // 2, 8)
        tile_m = min(1024, ((half + 7) // 8) * 8)
    n_tiles = pl.cdiv(M, tile_m)
    M_pad = n_tiles * tile_m
    if M_pad != M:
        # pad instead of asserting divisibility; padded rows are discarded below.
        x2d = jnp.pad(x2d, ((0, M_pad - M), (0, 0)))

    w_pred_t = params["w_pred"].T          # (1, Cf) row for the VPU pred head
    b_pred = params["b_pred"]              # (1, 1) scalar -> SMEM

    combined = pl.pallas_call(
        _encoder_kernel,
        out_shape=jax.ShapeDtypeStruct((M_pad, Cf + 1), jnp.float32),
        grid=(n_tiles,),
        in_specs=[
            pl.BlockSpec((tile_m, Cin), lambda i: (i, 0)),
            pl.BlockSpec((Cin, Cf), lambda i: (0, 0)),
            pl.BlockSpec((1, Cf), lambda i: (0, 0)),
            pl.BlockSpec((1, Cf), lambda i: (0, 0)),
            pl.BlockSpec(memory_space=pltpu.MemorySpace.SMEM),   # scalar bias
        ],
        out_specs=pl.BlockSpec((tile_m, Cf + 1), lambda i: (i, 0)),
        compiler_params=pltpu.CompilerParams(
            dimension_semantics=("parallel",),
            vmem_limit_bytes=32 * 1024 * 1024,
        ),
    )(x2d, params["w_feat"], params["b_feat"], w_pred_t, b_pred)

    combined = combined[:M]
    feat2d = combined[:, :Cf]
    pred2d = combined[:, Cf:Cf + 1]
    return pred2d, feat2d


# --------------------------------------------------------------------------------------
# similar_matrix2 semantics (exact):
#   chunk q,k into 4 along dim 0; l_pos = qfl @ kfh^T ; l_neg = qbl @ kbh^T
#   return 2.0 - mean(l_pos) - mean(l_neg)
# --------------------------------------------------------------------------------------
def _dot_nt(a, b):
    # einsum('nc,kc->nk') without materializing a transpose
    return jax.lax.dot_general(a, b, (((1,), (1,)), ((), ())),
                               preferred_element_type=jnp.float32)


def _sim2(q, k):
    n4 = q.shape[0] // 4
    l_pos = _dot_nt(q[n4:2 * n4], k[0:n4])
    l_neg = _dot_nt(q[3 * n4:4 * n4], k[2 * n4:3 * n4])
    return 2.0 - jnp.mean(l_pos) - jnp.mean(l_neg)


# --------------------------------------------------------------------------------------
# Kernel 2: fused regular() loss path
#   proj = MLP2(sel) ; pred = MLP2(proj) ; loss = sim2(pred, proj) + sim2(proj, pred)
#   (stop_gradient is a value-level no-op; forward value is identical.)
# --------------------------------------------------------------------------------------
def _regular_loss_kernel(sel_ref, pw1, pb1, pw2, pb2, qw1, qb1, qw2, qb2, o_ref):
    sel = sel_ref[...]
    h = jnp.maximum(jnp.dot(sel, pw1[...], preferred_element_type=jnp.float32) + pb1[...], 0.0)
    proj = jnp.dot(h, pw2[...], preferred_element_type=jnp.float32) + pb2[...]
    h2 = jnp.maximum(jnp.dot(proj, qw1[...], preferred_element_type=jnp.float32) + qb1[...], 0.0)
    pred = jnp.dot(h2, qw2[...], preferred_element_type=jnp.float32) + qb2[...]
    loss = _sim2(pred, proj) + _sim2(proj, pred)
    o_ref[...] = jnp.reshape(loss, (1, 1))


# --------------------------------------------------------------------------------------
# Kernel 3: fused sphere() loss path
#   proj = MLP2(sel) ; labels = [1]*N/2 + [0]*N/2 ; loss = sim2(proj, labels_broadcast)
# --------------------------------------------------------------------------------------
def _sphere_loss_kernel(sel_ref, pw1, pb1, pw2, pb2, o_ref):
    sel = sel_ref[...]
    h = jnp.maximum(jnp.dot(sel, pw1[...], preferred_element_type=jnp.float32) + pb1[...], 0.0)
    proj = jnp.dot(h, pw2[...], preferred_element_type=jnp.float32) + pb2[...]
    n = proj.shape[0]
    # TODO(synk): reference calls self.loss(feat, true_target) with integer labels;
    # stand-in broadcasts the label vector to the projection width (same einsum shapes).
    labels = (jax.lax.broadcasted_iota(jnp.int32, (n, 1), 0) < (n // 2)).astype(jnp.float32)
    k = jnp.broadcast_to(labels, proj.shape)
    o_ref[...] = jnp.reshape(_sim2(proj, k), (1, 1))


# --------------------------------------------------------------------------------------
# SIAM-level wrappers (plain JAX glue around the kernels)
# --------------------------------------------------------------------------------------
def _select_samples(feat2d, pred2d, n_samples):
    # TODO(synk): `sampler.select` is an external dependency; deterministic stand-in that
    # orders flattened pixels by pred and picks fg-high / fg-low / bg-high / bg-low rows.
    assert n_samples % 4 == 0
    order = jnp.argsort(-pred2d[:, 0])
    n4 = n_samples // 4
    idx = jnp.concatenate(
        [order[:n4], order[n4:2 * n4], order[-2 * n4:-n4], order[-n4:]])
    return feat2d[idx]                                   # (n_samples, Cf)


def siam_forward(image_nchw, params):
    """forward(): out = encoder(image); pred/feat kept in flattened (M, C) layout."""
    B, _, H, W = image_nchw.shape
    pred2d, feat2d = encoder_forward(image_nchw, params)
    out = jnp.transpose(pred2d.reshape(B, H, W, 1), (0, 3, 1, 2))   # NCHW, like torch
    return out, pred2d, feat2d


def siam_regular(feat2d, pred2d, params, n_samples=32, temperature=0.1):
    """regular(): sampled feats -> projector -> predictor -> symmetric sim2 loss (fused)."""
    # temperature is accepted but unused, exactly like the PyTorch reference.
    sel = _select_samples(feat2d, pred2d, n_samples)
    vmem = pl.BlockSpec(memory_space=pltpu.MemorySpace.VMEM)
    out = pl.pallas_call(
        _regular_loss_kernel,
        out_shape=jax.ShapeDtypeStruct((1, 1), jnp.float32),
        in_specs=[vmem] * 9,
        out_specs=vmem,
    )(sel,
      params["proj_w1"], params["proj_b1"], params["proj_w2"], params["proj_b2"],
      params["pred_w1"], params["pred_b1"], params["pred_w2"], params["pred_b2"])
    return out[0, 0]


def siam_sphere(feat2d, pred2d, params, n_samples=32):
    """sphere(): projector(selected feats) -> sim2(proj, true_target) (fused)."""
    sel = _select_samples(feat2d, pred2d, n_samples)
    vmem = pl.BlockSpec(memory_space=pltpu.MemorySpace.VMEM)
    out = pl.pallas_call(
        _sphere_loss_kernel,
        out_shape=jax.ShapeDtypeStruct((1, 1), jnp.float32),
        in_specs=[vmem] * 5,
        out_specs=vmem,
    )(sel, params["proj_w1"], params["proj_b1"], params["proj_w2"], params["proj_b2"])
    return out[0, 0]


# --------------------------------------------------------------------------------------
# Deterministic parameter init (shapes implied by SIAM's __init__: proj_num_length=64,
# proj_num_layers=2, pred_num_layers=2)
# --------------------------------------------------------------------------------------
def init_params(key, cin=4, cf=32, proj_len=64):
    ks = jax.random.split(key, 12)
    n = lambda k, shape: (0.1 * jax.random.normal(k, shape)).astype(jnp.float32)
    return {
        # synthetic encoder (1x1 convs)
        "w_feat": n(ks[0], (cin, cf)), "b_feat": n(ks[1], (1, cf)),
        "w_pred": n(ks[2], (cf, 1)),   "b_pred": n(ks[3], (1, 1)),
        # projector: Linear(cf, cf) -> ReLU -> Linear(cf, proj_len)
        "proj_w1": n(ks[4], (cf, cf)), "proj_b1": n(ks[5], (1, cf)),
        "proj_w2": n(ks[6], (cf, proj_len)), "proj_b2": n(ks[7], (1, proj_len)),
        # predictor: Linear(proj_len, proj_len) -> ReLU -> Linear(proj_len, proj_len)
        "pred_w1": n(ks[8], (proj_len, proj_len)), "pred_b1": n(ks[9], (1, proj_len)),
        "pred_w2": n(ks[10], (proj_len, proj_len)), "pred_b2": n(ks[11], (1, proj_len)),
    }


if __name__ == "__main__":
    key = jax.random.PRNGKey(0)
    kx, kp = jax.random.split(key)
    # NCHW image, consistent with PyTorch conv convention
    x = jax.random.normal(kx, (2, 4, 16, 16), dtype=jnp.float32)
    params = init_params(kp, cin=4, cf=32, proj_len=64)

    out, pred2d, feat2d = siam_forward(x, params)       # forward()
    loss_reg = siam_regular(feat2d, pred2d, params)     # regular() path
    loss_sph = siam_sphere(feat2d, pred2d, params)      # sphere() path

    jax.block_until_ready((out, pred2d, feat2d, loss_reg, loss_sph))
    print("KERNEL_OK")
</pallas_src>

<mosaic_0001>
module attributes {stable_mosaic.version = 11 : i64} {
  func.func @_encoder_kernel(%arg0: i32, %arg1: memref<256x4xf32, #tpu.memory_space<vmem>>, %arg2: memref<4x32xf32, #tpu.memory_space<vmem>>, %arg3: memref<1x32xf32, #tpu.memory_space<vmem>>, %arg4: memref<1x32xf32, #tpu.memory_space<vmem>>, %arg5: memref<1x1xf32, #tpu.memory_space<smem>>, %arg6: memref<256x33xf32, #tpu.memory_space<vmem>>) attributes {dimension_semantics = [#tpu.dimension_semantics<parallel>], iteration_bounds = array<i64: 2>, scalar_prefetch = 0 : i64, scratch_operands = 0 : i64, tpu.core_type = #tpu.core_type<tc>, window_params = [{transform_indices = @transform_0, window_bounds = array<i64: 256, 4>}, {pipeline_mode = #tpu.pipeline_mode<synchronous>, transform_indices = @transform_1, window_bounds = array<i64: 4, 32>}, {pipeline_mode = #tpu.pipeline_mode<synchronous>, transform_indices = @transform_2, window_bounds = array<i64: 1, 32>}, {pipeline_mode = #tpu.pipeline_mode<synchronous>, transform_indices = @transform_3, window_bounds = array<i64: 1, 32>}, {transform_indices = @transform_4, window_bounds = array<i64: 1, 1>}, {transform_indices = @transform_5, window_bounds = array<i64: 256, 33>}]} {
    %c0 = arith.constant 0 : index
    %c0_0 = arith.constant 0 : index
    %0 = vector.load %arg1[%c0, %c0_0] : memref<256x4xf32, #tpu.memory_space<vmem>>, vector<256x4xf32>
    %c0_1 = arith.constant 0 : index
    %c0_2 = arith.constant 0 : index
    %1 = vector.load %arg2[%c0_1, %c0_2] : memref<4x32xf32, #tpu.memory_space<vmem>>, vector<4x32xf32>
    %cst = arith.constant dense<0.000000e+00> : vector<256x32xf32>
    %2 = tpu.matmul %0, %1, %cst {dimension_numbers = #tpu.dot_dimension_numbers<[1], [0], [0], [1], [0, 0, 1, 1], [], []>} : vector<256x4xf32>, vector<4x32xf32>, vector<256x32xf32> -> vector<256x32xf32>
    %c0_3 = arith.constant 0 : index
    %c0_4 = arith.constant 0 : index
    %3 = vector.load %arg3[%c0_3, %c0_4] : memref<1x32xf32, #tpu.memory_space<vmem>>, vector<1x32xf32>
    %4 = vector.broadcast %3 : vector<1x32xf32> to vector<256x32xf32>
    %5 = arith.addf %2, %4 : vector<256x32xf32>
    %cst_5 = arith.constant 0.000000e+00 : f32
    %6 = vector.broadcast %cst_5 : f32 to vector<256x32xf32>
    %7 = arith.maximumf %5, %6 : vector<256x32xf32>
    %c0_6 = arith.constant 0 : index
    %c0_7 = arith.constant 0 : index
    %8 = vector.load %arg4[%c0_6, %c0_7] : memref<1x32xf32, #tpu.memory_space<vmem>>, vector<1x32xf32>
    %9 = vector.broadcast %8 : vector<1x32xf32> to vector<256x32xf32>
    %10 = arith.mulf %7, %9 : vector<256x32xf32>
    %cst_8 = arith.constant dense<0.000000e+00> : vector<256xf32>
    %11 = vector.multi_reduction <add>, %10, %cst_8 [1] : vector<256x32xf32> to vector<256xf32>
    %12 = vector.shape_cast %11 : vector<256xf32> to vector<256x1xf32>
    %c0_9 = arith.constant 0 : index
    %c0_10 = arith.constant 0 : index
    %13 = memref.load %arg5[%c0_9, %c0_10] : memref<1x1xf32, #tpu.memory_space<smem>>
    %14 = vector.broadcast %13 : f32 to vector<256x1xf32>
    %15 = arith.addf %12, %14 : vector<256x1xf32>
    %16 = arith.negf %15 : vector<256x1xf32>
    %17 = math.exp %16 : vector<256x1xf32>
    %cst_11 = arith.constant 1.000000e+00 : f32
    %18 = vector.broadcast %cst_11 : f32 to vector<256x1xf32>
    %19 = arith.addf %18, %17 : vector<256x1xf32>
    %20 = arith.divf %18, %19 : vector<256x1xf32>
    %c0_12 = arith.constant 0 : index
    %c0_13 = arith.constant 0 : index
    %21 = vector.load %arg6[%c0_12, %c0_13] : memref<256x33xf32, #tpu.memory_space<vmem>>, vector<256x32xf32>
    tpu.vector_store %arg6[%c0_12, %c0_13], %7 {strides = array<i32>} : memref<256x33xf32, #tpu.memory_space<vmem>>, vector<256x32xf32>,
    %c0_14 = arith.constant 0 : index
    %c32 = arith.constant 32 : index
    %22 = vector.load %arg6[%c0_14, %c32] : memref<256x33xf32, #tpu.memory_space<vmem>>, vector<256x1xf32>
    tpu.vector_store %arg6[%c0_14, %c32], %20 {strides = array<i32>} : memref<256x33xf32, #tpu.memory_space<vmem>>, vector<256x1xf32>,
    return
  }
  func.func @transform_0(%arg0: i32) -> (i32, i32) {
    %c0_i32 = arith.constant 0 : i32
    %c0_i32_0 = arith.constant 0 : i32
    return %arg0, %c0_i32 : i32, i32
  }
  func.func @transform_1(%arg0: i32) -> (i32, i32) {
    %c0_i32 = arith.constant 0 : i32
    %c0_i32_0 = arith.constant 0 : i32
    %c0_i32_1 = arith.constant 0 : i32
    return %c0_i32, %c0_i32_0 : i32, i32
  }
  func.func @transform_2(%arg0: i32) -> (i32, i32) {
    %c0_i32 = arith.constant 0 : i32
    %c0_i32_0 = arith.constant 0 : i32
    %c0_i32_1 = arith.constant 0 : i32
    return %c0_i32, %c0_i32_0 : i32, i32
  }
  func.func @transform_3(%arg0: i32) -> (i32, i32) {
    %c0_i32 = arith.constant 0 : i32
    %c0_i32_0 = arith.constant 0 : i32
    %c0_i32_1 = arith.constant 0 : i32
    return %c0_i32, %c0_i32_0 : i32, i32
  }
  func.func @transform_4(%arg0: i32) -> (i32, i32) {
    %c0_i32 = arith.constant 0 : i32
    %c0_i32_0 = arith.constant 0 : i32
    %c0_i32_1 = arith.constant 0 : i32
    return %c0_i32, %c0_i32_0 : i32, i32
  }
  func.func @transform_5(%arg0: i32) -> (i32, i32) {
    %c0_i32 = arith.constant 0 : i32
    %c0_i32_0 = arith.constant 0 : i32
    return %arg0, %c0_i32 : i32, i32
  }
}

</mosaic_0001>

<bundles_post_ra>
// kernel: tpu_custom_call.1
= control target key start
LH: loop header
LB: loop body
LE: loop exit
PB: predicated region body
PF: predicated region fallthrough
CT: control target
= control target key end

     0   :  { %s1450_s20 = smov 0   ;;  %s1918_s0 = inlined_call_operand.vmem [shape: f32[512,4], index: 0, kind: input, shape index: {}]   ;;  %s1919_s1 = inlined_call_operand.vmem [shape: f32[4,32], index: 1, kind: input, shape index: {}]   ;;  %s1920_s2 = inlined_call_operand.vmem [shape: f32[1,32], index: 2, kind: input, shape index: {}]   ;;  %s1921_s3 = inlined_call_operand.vmem [shape: f32[1,32], index: 3, kind: input, shape index: {}]   ;;  %s1922_s4 = inlined_call_operand.<no memory space> [shape: f32[1,1], index: 4, kind: input, shape index: {}]   ;;  %s1923_s5 = inlined_call_operand.vmem [shape: f32[512,33], index: 5, kind: output, shape index: {}]  }
   0x1   :  { %10 = sst [smem:[#allocation2]] %s1922_s4 }
   0x2 LB: > { %s1110_s21 = sadd.s32 4294967295, %s1415_s20   ;;  %p1114_p0 = scmp.ge.s32.totalorder %s1415_s20, 1  ;;  %s1415_s20 = sphi %s1450_s20, %s16_s20  }
   0x3   : > { %p189_p1 = scmp.lt.s32.totalorder %s1415_s20, 3 }
   0x5   : > { %p190_p2 = pnand %p1114_p0, %p189_p1 }
   0x6   : > { %s1115_s4 = sshll.u32 (!%p190_p2), %s1110_s21, 5  ;;  %s763_s10 = sld [smem:[#allocation2]] (!%p190_p2) }
   0x7   : > { %193 = sbr.rel (%p190_p2) target bundleno = 454 (0x1c6), region = 40  ;;  %p218_p3 = scmp.lt.s32.totalorder (!%p190_p2), %s1115_s4, 63 }
   0xc   : > { %v261_v0 = vld [vmem:[%s1919_s1] sm:$0xf]  ;;  %vm366_vm0 = vcmask 1043456   ;;  %s1925_s4 = smov (!%p218_p3, %s1115_s4), 63  ;;  %vm269_vm1 = vcmask 31744   ;;  %vm666_vm2 = vcmask 261120  }
   0xd   : > { %1221 = vmatprep.subr.msk.mxu0 %vm366_vm0, %v261_v0  ;;  %1271 = vmatprep.subr.msk.mxu1 %vm366_vm0, %v261_v0  ;;  %s1116_s24 = sshll.u32 %s1925_s4, 3  ;;  %v1538_v33 = vld [vmem:[%s1920_s2] ss:$0 sm:$0xff]  ;;  %vm1021_vm3 = vcmask 269568  }
   0xe   : > { %1222 = vmatpush3.msk.msra.mxu0 %vm366_vm0, %v261_v0  ;;  %1272 = vmatpush3.msk.msra.mxu1 %vm366_vm0, %v261_v0  ;;  %s1469_s27 = scalar_lea.vmem %s1918_s0, %s1116_s24  ;;  %s1547_s7 = scalar_lea.vmem %s1923_s5, %s1116_s24  ;;  %v1554_v44 = vld [vmem:[%s1921_s3] ss:$0 sm:$0xff] }
   0xf   : > { %v229_v1 = vld [vmem:[%s1469_s27] sm:$0xff]  ;;  %v230_v3 = vld [vmem:[%s1469_s27 + $0x8] sm:$0xff]  ;;  %v231_v5 = vld [vmem:[%s1469_s27 + $0x10] sm:$0xff] }
  0x10   : > { %v245_v2 = vld [vmem:[%s1469_s27 + $0x80] sm:$0xff]  ;;  %1223 = vmatprep.mubr.msk.f32.mxu0 %vm269_vm1, %v229_v1  ;;  %v246_v4 = vld [vmem:[%s1469_s27 + $0x88] sm:$0xff]  ;;  %v247_v6 = vld [vmem:[%s1469_s27 + $0x90] sm:$0xff] }
  0x11   : > { %1247 = vmatprep.mubr.msk.f32.mxu1 %vm269_vm1, %v245_v2  ;;  %1224 = vmatmul.mubr.msk.f32.vlgmr.msra.gmra.mxu0 %vm269_vm1, %v230_v3  ;;  %v232_v7 = vld [vmem:[%s1469_s27 + $0x18] sm:$0xff]  ;;  %v233_v9 = vld [vmem:[%s1469_s27 + $0x20] sm:$0xff]  ;;  %v234_v11 = vld [vmem:[%s1469_s27 + $0x28] sm:$0xff] }
  0x12   : > { %1248 = vmatmul.mubr.msk.f32.vlgmr.msra.gmra.mxu1 %vm269_vm1, %v246_v4  ;;  %1226 = vmatprep.mubr.msk.f32.mxu0 %vm269_vm1, %v231_v5  ;;  %v248_v8 = vld [vmem:[%s1469_s27 + $0x98] sm:$0xff]  ;;  %v249_v10 = vld [vmem:[%s1469_s27 + $0xa0] sm:$0xff]  ;;  %v250_v12 = vld [vmem:[%s1469_s27 + $0xa8] sm:$0xff] }
  0x13   : > { %1250 = vmatprep.mubr.msk.f32.mxu1 %vm269_vm1, %v247_v6  ;;  %v235_v13 = vld [vmem:[%s1469_s27 + $0x30] sm:$0xff]  ;;  %v236_v15 = vld [vmem:[%s1469_s27 + $0x38] sm:$0xff]  ;;  %v237_v17 = vld [vmem:[%s1469_s27 + $0x40] sm:$0xff] }
  0x14   : > { %v251_v14 = vld [vmem:[%s1469_s27 + $0xb0] sm:$0xff]  ;;  %v252_v16 = vld [vmem:[%s1469_s27 + $0xb8] sm:$0xff]  ;;  %v253_v18 = vld [vmem:[%s1469_s27 + $0xc0] sm:$0xff] }
  0x15   : > { %1227 = vmatmul.mubr.msk.f32.gmra.mxu0 %vm269_vm1, %v232_v7  ;;  %v238_v19 = vld [vmem:[%s1469_s27 + $0x48] sm:$0xff]  ;;  %v239_v21 = vld [vmem:[%s1469_s27 + $0x50] sm:$0xff]  ;;  %v240_v23 = vld [vmem:[%s1469_s27 + $0x58] sm:$0xff] }
  0x16   : > { %1251 = vmatmul.mubr.msk.f32.gmra.mxu1 %vm269_vm1, %v248_v8  ;;  %1229 = vmatprep.mubr.msk.f32.mxu0 %vm269_vm1, %v233_v9  ;;  %v254_v20 = vld [vmem:[%s1469_s27 + $0xc8] sm:$0xff]  ;;  %v255_v22 = vld [vmem:[%s1469_s27 + $0xd0] sm:$0xff]  ;;  %v256_v24 = vld [vmem:[%s1469_s27 + $0xd8] sm:$0xff] }
  0x17   : > { %1253 = vmatprep.mubr.msk.f32.mxu1 %vm269_vm1, %v249_v10  ;;  %v241_v25 = vld [vmem:[%s1469_s27 + $0x60] sm:$0xff]  ;;  %v242_v27 = vld [vmem:[%s1469_s27 + $0x68] sm:$0xff]  ;;  %v243_v29 = vld [vmem:[%s1469_s27 + $0x70] sm:$0xff] }
  0x18   : > { %v257_v26 = vld [vmem:[%s1469_s27 + $0xe0] sm:$0xff]  ;;  %v258_v28 = vld [vmem:[%s1469_s27 + $0xe8] sm:$0xff]  ;;  %v259_v30 = vld [vmem:[%s1469_s27 + $0xf0] sm:$0xff] }
  0x19   : > { %1230 = vmatmul.mubr.msk.f32.gmra.mxu0 %vm269_vm1, %v234_v11  ;;  %v244_v31 = vld [vmem:[%s1469_s27 + $0x78] sm:$0xff] }
  0x1a   : > { %1254 = vmatmul.mubr.msk.f32.gmra.mxu1 %vm269_vm1, %v250_v12  ;;  %1232 = vmatprep.mubr.msk.f32.mxu0 %vm269_vm1, %v235_v13  ;;  %v260_v32 = vld [vmem:[%s1469_s27 + $0xf8] sm:$0xff] }
  0x1b   : > { %1256 = vmatprep.mubr.msk.f32.mxu1 %vm269_vm1, %v251_v14 }
  0x1d   : > { %1233 = vmatmul.mubr.msk.f32.gmra.mxu0 %vm269_vm1, %v236_v15 }
  0x1e   : > { %1257 = vmatmul.mubr.msk.f32.gmra.mxu1 %vm269_vm1, %v252_v16  ;;  %1235 = vmatprep.mubr.msk.f32.mxu0 %vm269_vm1, %v237_v17 }
  0x1f   : > { %1259 = vmatprep.mubr.msk.f32.mxu1 %vm269_vm1, %v253_v18 }
  0x21   : > { %1236 = vmatmul.mubr.msk.f32.gmra.mxu0 %vm269_vm1, %v238_v19 }
  0x22   : > { %1260 = vmatmul.mubr.msk.f32.gmra.mxu1 %vm269_vm1, %v254_v20  ;;  %1238 = vmatprep.mubr.msk.f32.mxu0 %vm269_vm1, %v239_v21 }
  0x23   : > { %1262 = vmatprep.mubr.msk.f32.mxu1 %vm269_vm1, %v255_v22 }
  0x25   : > { %1239 = vmatmul.mubr.msk.f32.gmra.mxu0 %vm269_vm1, %v240_v23 }
  0x26   : > { %1263 = vmatmul.mubr.msk.f32.gmra.mxu1 %vm269_vm1, %v256_v24  ;;  %1241 = vmatprep.mubr.msk.f32.mxu0 %vm269_vm1, %v241_v25 }
  0x27   : > { %1265 = vmatprep.mubr.msk.f32.mxu1 %vm269_vm1, %v257_v26 }
  0x29   : > { %1242 = vmatmul.mubr.msk.f32.gmra.mxu0 %vm269_vm1, %v242_v27 }
  0x2a   : > { %1266 = vmatmul.mubr.msk.f32.gmra.mxu1 %vm269_vm1, %v258_v28  ;;  %1244 = vmatprep.mubr.msk.f32.mxu0 %vm269_vm1, %v243_v29 }
  0x2b   : > { %1268 = vmatprep.mubr.msk.f32.mxu1 %vm269_vm1, %v259_v30 }
  0x2d   : > { %1245 = vmatmul.mubr.msk.f32.gmra.mxu0 %vm269_vm1, %v244_v31 }
  0x2e   : > { %1269 = vmatmul.mubr.msk.f32.gmra.mxu1 %vm269_vm1, %v260_v32 }
  0xd1   : > { %v1225_v34 = vpop.f32.mrf.mxu0 }
  0xd2   : > { %v1249_v35 = vpop.f32.mrf.mxu1  ;;  %v442_v36 = vadd.f32 %v1225_v34, %v1538_v33 }
  0xd3   : > { %v522_v37 = vadd.f32 %v1249_v35, %v1538_v33  ;;  %v436_v38 = vpop.f32.mrf.mxu0 }
  0xd4   : > { %v516_v39 = vpop.f32.mrf.mxu1  ;;  %v596_v40 = vmax.f32 %v442_v36, 0.0  ;;  %v437_v42 = vadd.f32 %v1538_v33, %v436_v38 }
  0xd5   : > { %v612_v41 = vmax.f32 %v522_v37, 0.0  ;;  %v517_v43 = vadd.f32 %v1538_v33, %v516_v39  ;;  %v1228_v45 = vpop.f32.mrf.mxu0 }
  0xd6   : > { %v1252_v46 = vpop.f32.mrf.mxu1  ;;  %990 = vst.msk [vmem:[%s1547_s7 + $0x8] sm:$0xff] %vm666_vm2, %v596_v40  ;;  %v595_v47 = vmax.f32 %v437_v42, 0.0  ;;  %v452_v49 = vadd.f32 %v1228_v45, %v1538_v33  ;;  %v635_v54 = vmul.f32 %v1554_v44, %v596_v40 }
  0xd7   : > { %1006 = vst.msk [vmem:[%s1547_s7 + $0x88] sm:$0xff] %vm666_vm2, %v612_v41  ;;  %v611_v48 = vmax.f32 %v517_v43, 0.0  ;;  %v532_v50 = vadd.f32 %v1252_v46, %v1538_v33  ;;  %v446_v51 = vpop.f32.mrf.mxu0  ;;  %v651_v52 = vmul.f32 %v1554_v44, %v612_v41 }
  0xd8   : > { %v526_v53 = vpop.f32.mrf.mxu1  ;;  %989 = vst.msk [vmem:[%s1547_s7] sm:$0xff] %vm666_vm2, %v595_v47  ;;  %v598_v55 = vmax.f32 %v452_v49, 0.0  ;;  %v447_v56 = vadd.f32 %v1538_v33, %v446_v51  ;;  %v670_v60 = vsel %vm666_vm2, %v635_v54, 0.0  ;;  %v634_v62 = vmul.f32 %v1554_v44, %v595_v47 }
  0xd9   : > { %1005 = vst.msk [vmem:[%s1547_s7 + $0x80] sm:$0xff] %vm666_vm2, %v611_v48  ;;  %v614_v57 = vmax.f32 %v532_v50, 0.0  ;;  %v527_v58 = vadd.f32 %v1538_v33, %v526_v53  ;;  %v718_v59 = vsel %vm666_vm2, %v651_v52, 0.0  ;;  %v1231_v61 = vpop.f32.mrf.mxu0  ;;  %671 = vadd.xlane.f32.xlu0 %v670_v60  ;;  %v650_v14 = vmul.f32 %v1554_v44, %v611_v48 }
  0xda   : > { %v1255_v63 = vpop.f32.mrf.mxu1  ;;  %992 = vst.msk [vmem:[%s1547_s7 + $0x18] sm:$0xff] %vm666_vm2, %v598_v55  ;;  %v597_v0 = vmax.f32 %v447_v56, 0.0  ;;  %719 = vadd.xlane.f32.xlu1 %v718_v59  ;;  %v637_v2 = vmul.f32 %v1554_v44, %v598_v55  ;;  %v462_v3 = vadd.f32 %v1231_v61, %v1538_v33  ;;  %v667_v12 = vsel %vm666_vm2, %v634_v62, 0.0 }
  0xdb   : > { %1008 = vst.msk [vmem:[%s1547_s7 + $0x98] sm:$0xff] %vm666_vm2, %v614_v57  ;;  %v613_v1 = vmax.f32 %v527_v58, 0.0  ;;  %v456_v4 = vpop.f32.mrf.mxu0  ;;  %v1580_v5 = vadd.f32 %v1255_v63, %v1538_v33  ;;  %v653_v6 = vmul.f32 %v1554_v44, %v614_v57  ;;  %v715_v28 = vsel %vm666_vm2, %v650_v14, 0.0 }
  0xdc   : > { %v536_v7 = vpop.f32.mrf.mxu1  ;;  %991 = vst.msk [vmem:[%s1547_s7 + $0x10] sm:$0xff] %vm666_vm2, %v597_v0  ;;  %v676_v8 = vsel %vm666_vm2, %v637_v2, 0.0  ;;  %v600_v9 = vmax.f32 %v462_v3, 0.0  ;;  %v457_v10 = vadd.f32 %v1538_v33, %v456_v4  ;;  %v636_v25 = vmul.f32 %v1554_v44, %v597_v0 }
  0xdd   : > { %1007 = vst.msk [vmem:[%s1547_s7 + $0x90] sm:$0xff] %vm666_vm2, %v613_v1  ;;  %v1590_v11 = vadd.f32 %v1538_v33, %v536_v7  ;;  %v616_v13 = vmax.f32 %v1580_v5, 0.0  ;;  %v1234_v15 = vpop.f32.mrf.mxu0  ;;  %668 = vadd.xlane.f32.xlu0 %v667_v12  ;;  %v724_v21 = vsel %vm666_vm2, %v653_v6, 0.0  ;;  %v652_v29 = vmul.f32 %v1554_v44, %v613_v1 }
  0xde   : > { %v1258_v16 = vpop.f32.mrf.mxu1  ;;  %677 = vadd.xlane.f32.xlu1 %v676_v8  ;;  %994 = vst.msk [vmem:[%s1547_s7 + $0x28] sm:$0xff] %vm666_vm2, %v600_v9  ;;  %v599_v17 = vmax.f32 %v457_v10, 0.0  ;;  %v1599_v19 = vadd.f32 %v1234_v15, %v1538_v33  ;;  %v673_v40 = vsel %vm666_vm2, %v636_v25, 0.0  ;;  %v639_v46 = vmul.f32 %v1554_v44, %v600_v9 }
  0xdf   : > { %v615_v18 = vmax.f32 %v1590_v11, 0.0  ;;  %v1602_v20 = vadd.f32 %v1258_v16, %v1538_v33  ;;  %1010 = vst.msk [vmem:[%s1547_s7 + $0xa8] sm:$0xff] %vm666_vm2, %v616_v13  ;;  %v466_v22 = vpop.f32.mrf.mxu0  ;;  %v721_v45 = vsel %vm666_vm2, %v652_v29, 0.0  ;;  %v655_v57 = vmul.f32 %v1554_v44, %v616_v13 }
  0xe0   : > { %v546_v23 = vpop.f32.mrf.mxu1  ;;  %993 = vst.msk [vmem:[%s1547_s7 + $0x20] sm:$0xff] %vm666_vm2, %v599_v17  ;;  %v602_v24 = vmax.f32 %v1599_v19, 0.0  ;;  %v1614_v26 = vadd.f32 %v1538_v33, %v466_v22  ;;  %v638_v47 = vmul.f32 %v1554_v44, %v599_v17  ;;  %v682_v61 = vsel %vm666_vm2, %v639_v46, 0.0 }
  0xe1   : > { %1009 = vst.msk [vmem:[%s1547_s7 + $0xa0] sm:$0xff] %vm666_vm2, %v615_v18  ;;  %v618_v27 = vmax.f32 %v1602_v20, 0.0  ;;  %v1620_v30 = vadd.f32 %v1538_v33, %v546_v23  ;;  %v1237_v31 = vpop.f32.mrf.mxu0  ;;  %716 = vadd.xlane.f32.xlu0 %v715_v28  ;;  %v654_v63 = vmul.f32 %v1554_v44, %v615_v18  ;;  %v730_v9 = vsel %vm666_vm2, %v655_v57, 0.0 }
  0xe2   : > { %v1261_v32 = vpop.f32.mrf.mxu1  ;;  %725 = vadd.xlane.f32.xlu1 %v724_v21  ;;  %996 = vst.msk [vmem:[%s1547_s7 + $0x38] sm:$0xff] %vm666_vm2, %v602_v24  ;;  %v601_v34 = vmax.f32 %v1614_v26, 0.0  ;;  %v1632_v35 = vadd.f32 %v1237_v31, %v1538_v33  ;;  %v679_v62 = vsel %vm666_vm2, %v638_v47, 0.0  ;;  %v641_v14 = vmul.f32 %v1554_v44, %v602_v24 }
  0xe3   : > { %1012 = vst.msk [vmem:[%s1547_s7 + $0xb8] sm:$0xff] %vm666_vm2, %v618_v27  ;;  %v1635_v36 = vadd.f32 %v1261_v32, %v1538_v33  ;;  %v617_v37 = vmax.f32 %v1620_v30, 0.0  ;;  %v476_v38 = vpop.f32.mrf.mxu0  ;;  %v727_v13 = vsel %vm666_vm2, %v654_v63, 0.0  ;;  %v657_v26 = vmul.f32 %v1554_v44, %v618_v27 }
  0xe4   : > { %v556_v39 = vpop.f32.mrf.mxu1  ;;  %995 = vst.msk [vmem:[%s1547_s7 + $0x30] sm:$0xff] %vm666_vm2, %v601_v34  ;;  %v604_v41 = vmax.f32 %v1632_v35, 0.0  ;;  %v1643_v42 = vadd.f32 %v1538_v33, %v476_v38  ;;  %v640_v15 = vmul.f32 %v1554_v44, %v601_v34  ;;  %v688_v32 = vsel %vm666_vm2, %v641_v14, 0.0 }
  0xe5   : > { %v620_v43 = vmax.f32 %v1635_v36, 0.0  ;;  %1011 = vst.msk [vmem:[%s1547_s7 + $0xb0] sm:$0xff] %vm666_vm2, %v617_v37  ;;  %v1654_v48 = vadd.f32 %v1538_v33, %v556_v39  ;;  %v1240_v49 = vpop.f32.mrf.mxu0  ;;  %722 = vadd.xlane.f32.xlu0 %v721_v45  ;;  %v656_v38 = vmul.f32 %v1554_v44, %v617_v37 }
  0xe6   : > { %v1264_v50 = vpop.f32.mrf.mxu1  ;;  %674 = vadd.xlane.f32.xlu1 %v673_v40  ;;  %998 = vst.msk [vmem:[%s1547_s7 + $0x48] sm:$0xff] %vm666_vm2, %v604_v41  ;;  %v603_v51 = vmax.f32 %v1643_v42, 0.0  ;;  %v1666_v52 = vadd.f32 %v1240_v49, %v1538_v33  ;;  %v685_v34 = vsel %vm666_vm2, %v640_v15, 0.0  ;;  %v736_v40 = vsel %vm666_vm2, %v657_v26, 0.0 }
  0xe7   : > { %1014 = vst.msk [vmem:[%s1547_s7 + $0xc8] sm:$0xff] %vm666_vm2, %v620_v43  ;;  %v1669_v53 = vadd.f32 %v1264_v50, %v1538_v33  ;;  %v619_v54 = vmax.f32 %v1654_v48, 0.0  ;;  %v486_v55 = vpop.f32.mrf.mxu0  ;;  %v733_v30 = vsel %vm666_vm2, %v656_v38, 0.0  ;;  %v643_v37 = vmul.f32 %v1554_v44, %v604_v41 }
  0xe8   : > { %v566_v56 = vpop.f32.mrf.mxu1  ;;  %997 = vst.msk [vmem:[%s1547_s7 + $0x40] sm:$0xff] %vm666_vm2, %v603_v51  ;;  %v606_v58 = vmax.f32 %v1666_v52, 0.0  ;;  %v1679_v59 = vadd.f32 %v1538_v33, %v486_v55  ;;  %v659_v47 = vmul.f32 %v1554_v44, %v620_v43 }
  0xe9   : > { %v622_v60 = vmax.f32 %v1669_v53, 0.0  ;;  %1013 = vst.msk [vmem:[%s1547_s7 + $0xc0] sm:$0xff] %vm666_vm2, %v619_v54  ;;  %v1690_v0 = vadd.f32 %v1538_v33, %v566_v56  ;;  %v1243_v1 = vpop.f32.mrf.mxu0  ;;  %680 = vadd.xlane.f32.xlu0 %v679_v62  ;;  %v694_v45 = vsel %vm666_vm2, %v643_v37, 0.0  ;;  %v658_v35 = vmul.f32 %v1554_v44, %v619_v54 }
  0xea   : > { %v1267_v2 = vpop.f32.mrf.mxu1  ;;  %683 = vadd.xlane.f32.xlu1 %v682_v61  ;;  %1000 = vst.msk [vmem:[%s1547_s7 + $0x58] sm:$0xff] %vm666_vm2, %v606_v58  ;;  %v605_v3 = vmax.f32 %v1679_v59, 0.0  ;;  %v1702_v4 = vadd.f32 %v1243_v1, %v1538_v33  ;;  %v742_v41 = vsel %vm666_vm2, %v659_v47, 0.0  ;;  %v645_v49 = vmul.f32 %v1554_v44, %v606_v58 }
  0xeb   : > { %1016 = vst.msk [vmem:[%s1547_s7 + $0xd8] sm:$0xff] %vm666_vm2, %v622_v60  ;;  %v1705_v5 = vadd.f32 %v1267_v2, %v1538_v33  ;;  %v621_v6 = vmax.f32 %v1690_v0, 0.0  ;;  %v496_v7 = vpop.f32.mrf.mxu0  ;;  %v739_v42 = vsel %vm666_vm2, %v658_v35, 0.0  ;;  %v661_v48 = vmul.f32 %v1554_v44, %v622_v60 }
  0xec   : > { %v576_v8 = vpop.f32.mrf.mxu1  ;;  %999 = vst.msk [vmem:[%s1547_s7 + $0x50] sm:$0xff] %vm666_vm2, %v605_v3  ;;  %v608_v10 = vmax.f32 %v1702_v4, 0.0  ;;  %v1713_v11 = vadd.f32 %v1538_v33, %v496_v7  ;;  %v644_v50 = vmul.f32 %v1554_v44, %v605_v3  ;;  %v700_v36 = vsel %vm666_vm2, %v645_v49, 0.0 }
  0xed   : > { %v624_v12 = vmax.f32 %v1705_v5, 0.0  ;;  %1015 = vst.msk [vmem:[%s1547_s7 + $0xd0] sm:$0xff] %vm666_vm2, %v621_v6  ;;  %v1726_v16 = vadd.f32 %v1538_v33, %v576_v8  ;;  %v1246_v17 = vpop.f32.mrf.mxu0  ;;  %728 = vadd.xlane.f32.xlu0 %v727_v13  ;;  %v748_v52 = vsel %vm666_vm2, %v661_v48, 0.0 }
  0xee   : > { %v1270_v18 = vpop.f32.mrf.mxu1  ;;  %731 = vadd.xlane.f32.xlu1 %v730_v9  ;;  %1002 = vst.msk [vmem:[%s1547_s7 + $0x68] sm:$0xff] %vm666_vm2, %v608_v10  ;;  %v607_v19 = vmax.f32 %v1713_v11, 0.0  ;;  %v512_v21 = vadd.f32 %v1246_v17, %v1538_v33  ;;  %v697_v43 = vsel %vm666_vm2, %v644_v50, 0.0  ;;  %v647_v55 = vmul.f32 %v1554_v44, %v608_v10 }
  0xef   : > { %1018 = vst.msk [vmem:[%s1547_s7 + $0xe8] sm:$0xff] %vm666_vm2, %v624_v12  ;;  %v1739_v22 = vadd.f32 %v1270_v18, %v1538_v33  ;;  %v623_v23 = vmax.f32 %v1726_v16, 0.0  ;;  %v506_v24 = vpop.f32.mrf.mxu0  ;;  %v663_v58 = vmul.f32 %v1554_v44, %v624_v12 }
  0xf0   : > { %v586_v25 = vpop.f32.mrf.mxu1  ;;  %1001 = vst.msk [vmem:[%s1547_s7 + $0x60] sm:$0xff] %vm666_vm2, %v607_v19  ;;  %v610_v28 = vmax.f32 %v512_v21, 0.0  ;;  %v507_v29 = vadd.f32 %v1538_v33, %v506_v24  ;;  %v646_v56 = vmul.f32 %v1554_v44, %v607_v19  ;;  %v706_v53 = vsel %vm666_vm2, %v647_v55, 0.0 }
  0xf1   : > { %v626_v31 = vmax.f32 %v1739_v22, 0.0  ;;  %1017 = vst.msk [vmem:[%s1547_s7 + $0xe0] sm:$0xff] %vm666_vm2, %v623_v23  ;;  %v587_v20 = vadd.f32 %v1538_v33, %v586_v25  ;;  %686 = vadd.xlane.f32.xlu0 %v685_v34  ;;  %v642_v33 = vmul.f32 %v1554_v44, %v603_v51  ;;  %v660_v51 = vmul.f32 %v1554_v44, %v621_v6 }
  0xf2   : > { %689 = vadd.xlane.f32.xlu1 %v688_v32  ;;  %1004 = vst.msk [vmem:[%s1547_s7 + $0x78] sm:$0xff] %vm666_vm2, %v610_v28  ;;  %v609_v27 = vmax.f32 %v507_v29, 0.0  ;;  %v703_v57 = vsel %vm666_vm2, %v646_v56, 0.0  ;;  %v662_v59 = vmul.f32 %v1554_v44, %v623_v23  ;;  %v754_v60 = vsel %vm666_vm2, %v663_v58, 0.0 }
  0xf3   : > { %1020 = vst.msk [vmem:[%s1547_s7 + $0xf8] sm:$0xff] %vm666_vm2, %v626_v31  ;;  %v625_v39 = vmax.f32 %v587_v20, 0.0  ;;  %v691_v46 = vsel %vm666_vm2, %v642_v33, 0.0  ;;  %v745_v54 = vsel %vm666_vm2, %v660_v51, 0.0  ;;  %v649_v62 = vmul.f32 %v1554_v44, %v610_v28 }
  0xf4   : > { %1003 = vst.msk [vmem:[%s1547_s7 + $0x70] sm:$0xff] %vm666_vm2, %v609_v27  ;;  %v751_v61 = vsel %vm666_vm2, %v662_v59, 0.0  ;;  %v648_v63 = vmul.f32 %v1554_v44, %v609_v27  ;;  %v665_v2 = vmul.f32 %v1554_v44, %v626_v31  ;;  %v1817_v6 = vstv %s763_s10 }
  0xf5   : > { %1019 = vst.msk [vmem:[%s1547_s7 + $0xf0] sm:$0xff] %vm666_vm2, %v625_v39  ;;  %734 = vadd.xlane.f32.xlu0 %v733_v30  ;;  %v712_v0 = vsel %vm666_vm2, %v649_v62, 0.0  ;;  %v664_v3 = vmul.f32 %v1554_v44, %v625_v39 }
  0xf6   : > { %737 = vadd.xlane.f32.xlu1 %v736_v40  ;;  %v709_v1 = vsel %vm666_vm2, %v648_v63, 0.0  ;;  %v760_v4 = vsel %vm666_vm2, %v665_v2, 0.0 }
  0xf7   : > { %v757_v5 = vsel %vm666_vm2, %v664_v3, 0.0 }
  0xf9   : > { %692 = vadd.xlane.f32.xlu0 %v691_v46 }
  0xfa   : > { %695 = vadd.xlane.f32.xlu1 %v694_v45 }
  0xfd   : > { %740 = vadd.xlane.f32.xlu0 %v739_v42 }
  0xfe   : > { %743 = vadd.xlane.f32.xlu1 %v742_v41 }
 0x101   : > { %698 = vadd.xlane.f32.xlu0 %v697_v43 }
 0x102   : > { %701 = vadd.xlane.f32.xlu1 %v700_v36 }
 0x105   : > { %746 = vadd.xlane.f32.xlu0 %v745_v54 }
 0x106   : > { %749 = vadd.xlane.f32.xlu1 %v748_v52 }
 0x109   : > { %704 = vadd.xlane.f32.xlu0 %v703_v57 }
 0x10a   : > { %707 = vadd.xlane.f32.xlu1 %v706_v53 }
 0x10d   : > { %752 = vadd.xlane.f32.xlu0 %v751_v61 }
 0x10e   : > { %755 = vadd.xlane.f32.xlu1 %v754_v60 }
 0x111   : > { %710 = vadd.xlane.f32.xlu0 %v709_v1 }
 0x112   : > { %713 = vadd.xlane.f32.xlu1 %v712_v0 }
 0x115   : > { %758 = vadd.xlane.f32.xlu0 %v757_v5 }
 0x116   : > { %761 = vadd.xlane.f32.xlu1 %v760_v4 }
 0x162   : > { %v672_v8 = vpop.xlane.xlu0 %671 }
 0x163   : > { %v720_v7 = vpop.xlane.xlu1 %719  ;;  %v766_v10 = vadd.f32 %v1817_v6, %v672_v8 }
 0x164   : > { %v782_v9 = vadd.f32 %v1817_v6, %v720_v7 }
 0x165   : > { %v1155_v12 = vmul.f32 -1.442695, %v766_v10 }
 0x166   : > { %v1171_v11 = vmul.f32 -1.442695, %v782_v9  ;;  %v669_v13 = vpop.xlane.xlu0 %668 }
 0x167   : > { %v678_v44 = vpop.xlane.xlu1 %677  ;;  %v765_v15 = vadd.f32 %v1817_v6, %v669_v13 }
 0x168   : > { %1281 = vpow2.f32 %v1171_v11  ;;  %v768_v14 = vadd.f32 %v1817_v6, %v678_v44 }
 0x169   : > { %1283 = vpow2.f32 %v1155_v12  ;;  %v1154_v17 = vmul.f32 -1.442695, %v765_v15 }
 0x16a   : > { %v1157_v16 = vmul.f32 -1.442695, %v768_v14  ;;  %v717_v19 = vpop.xlane.xlu0 %716 }
 0x16b   : > { %v726_v18 = vpop.xlane.xlu1 %725  ;;  %v781_v22 = vadd.f32 %v1817_v6, %v717_v19 }
 0x16c   : > { %1285 = vpow2.f32 %v1157_v16  ;;  %v784_v21 = vadd.f32 %v1817_v6, %v726_v18 }
 0x16d   : > { %1287 = vpow2.f32 %v1154_v17  ;;  %v1170_v24 = vmul.f32 -1.442695, %v781_v22 }
 0x16e   : > { %v1173_v23 = vmul.f32 -1.442695, %v784_v21  ;;  %v723_v26 = vpop.xlane.xlu0 %722 }
 0x16f   : > { %v675_v25 = vpop.xlane.xlu1 %674  ;;  %v783_v29 = vadd.f32 %v1817_v6, %v723_v26 }
 0x170   : > { %1289 = vpow2.f32 %v1173_v23  ;;  %v767_v28 = vadd.f32 %v1817_v6, %v675_v25 }
 0x171   : > { %1291 = vpow2.f32 %v1170_v24  ;;  %v1172_v32 = vmul.f32 -1.442695, %v783_v29 }
 0x172   : > { %v1156_v31 = vmul.f32 -1.442695, %v767_v28  ;;  %v681_v38 = vpop.xlane.xlu0 %680 }
 0x173   : > { %v684_v34 = vpop.xlane.xlu1 %683  ;;  %v769_v27 = vadd.f32 %v1817_v6, %v681_v38 }
 0x174   : > { %1293 = vpow2.f32 %v1156_v31  ;;  %v770_v20 = vadd.f32 %v1817_v6, %v684_v34 }
 0x175   : > { %v1282_v39 = vpop.eup %1281  ;;  %1295 = vpow2.f32 %v1172_v32  ;;  %v1158_v45 = vmul.f32 -1.442695, %v769_v27 }
 0x176   : > { %v1284_v40 = vpop.eup %1283  ;;  %v910_v30 = vadd.f32 1.0, %v1282_v39  ;;  %v1159_v37 = vmul.f32 -1.442695, %v770_v20  ;;  %v729_v47 = vpop.xlane.xlu0 %728 }
 0x177   : > { %v894_v33 = vadd.f32 1.0, %v1284_v40  ;;  %v732_v46 = vpop.xlane.xlu1 %731  ;;  %v785_v41 = vadd.f32 %v1817_v6, %v729_v47 }
 0x178   : > { %1297 = vrcp.f32 %v910_v30  ;;  %v786_v35 = vadd.f32 %v1817_v6, %v732_v46 }
 0x179   : > { %v1286_v42 = vpop.eup %1285  ;;  %1299 = vrcp.f32 %v894_v33  ;;  %v1174_v48 = vmul.f32 -1.442695, %v785_v41 }
 0x17a   : > { %v1288_v49 = vpop.eup %1287  ;;  %v896_v50 = vadd.f32 1.0, %v1286_v42  ;;  %1301 = vpow2.f32 %v1159_v37  ;;  %v1175_v36 = vmul.f32 -1.442695, %v786_v35  ;;  %v687_v52 = vpop.xlane.xlu0 %686 }
 0x17b   : > { %v893_v43 = vadd.f32 1.0, %v1288_v49  ;;  %1303 = vpow2.f32 %v1158_v45  ;;  %v690_v51 = vpop.xlane.xlu1 %689  ;;  %v771_v55 = vadd.f32 %v1817_v6, %v687_v52 }
 0x17c   : > { %1305 = vrcp.f32 %v896_v50  ;;  %v772_v54 = vadd.f32 %v1817_v6, %v690_v51 }
 0x17d   : > { %v1290_v56 = vpop.eup %1289  ;;  %1307 = vrcp.f32 %v893_v43  ;;  %v1160_v60 = vmul.f32 -1.442695, %v771_v55 }
 0x17e   : > { %v1292_v53 = vpop.eup %1291  ;;  %v912_v57 = vadd.f32 1.0, %v1290_v56  ;;  %1309 = vpow2.f32 %v1175_v36  ;;  %v1161_v58 = vmul.f32 -1.442695, %v772_v54  ;;  %v735_v62 = vpop.xlane.xlu0 %734 }
 0x17f   : > { %v909_v59 = vadd.f32 1.0, %v1292_v53  ;;  %1311 = vpow2.f32 %v1174_v48  ;;  %v738_v61 = vpop.xlane.xlu1 %737  ;;  %v787_v0 = vadd.f32 %v1817_v6, %v735_v62 }
 0x180   : > { %1313 = vrcp.f32 %v912_v57  ;;  %v788_v63 = vadd.f32 %v1817_v6, %v738_v61 }
 0x181   : > { %v1294_v1 = vpop.eup %1293  ;;  %1315 = vrcp.f32 %v909_v59  ;;  %v1176_v7 = vmul.f32 -1.442695, %v787_v0 }
 0x182   : > { %v1296_v2 = vpop.eup %1295  ;;  %v895_v3 = vadd.f32 1.0, %v1294_v1  ;;  %1317 = vpow2.f32 %v1161_v58  ;;  %v1177_v4 = vmul.f32 -1.442695, %v788_v63  ;;  %v693_v9 = vpop.xlane.xlu0 %692 }
 0x183   : > { %v911_v5 = vadd.f32 1.0, %v1296_v2  ;;  %1319 = vpow2.f32 %v1160_v60  ;;  %v696_v8 = vpop.xlane.xlu1 %695  ;;  %v773_v11 = vadd.f32 %v1817_v6, %v693_v9 }
 0x184   : > { %1321 = vrcp.f32 %v895_v3  ;;  %v774_v10 = vadd.f32 %v1817_v6, %v696_v8 }
 0x185   : > { %v1298_v12 = vpop.eup %1297  ;;  %1323 = vrcp.f32 %v911_v5  ;;  %v1162_v14 = vmul.f32 -1.442695, %v773_v11 }
 0x186   : > { %v1300_v44 = vpop.eup %1299  ;;  %1039 = vst.msk [vmem:[%s1547_s7 + $0x88] sm:$0xff] %vm1021_vm3, %v1298_v12  ;;  %1325 = vpow2.f32 %v1177_v4  ;;  %v1163_v13 = vmul.f32 -1.442695, %v774_v10  ;;  %v741_v17 = vpop.xlane.xlu0 %740 }
 0x187   : > { %v1302_v15 = vpop.eup %1301  ;;  %1023 = vst.msk [vmem:[%s1547_s7 + $0x8] sm:$0xff] %vm1021_vm3, %v1300_v44  ;;  %1327 = vpow2.f32 %v1176_v7  ;;  %v744_v16 = vpop.xlane.xlu1 %743  ;;  %v789_v22 = vadd.f32 %v1817_v6, %v741_v17 }
 0x188   : > { %v1304_v18 = vpop.eup %1303  ;;  %v898_v19 = vadd.f32 1.0, %v1302_v15  ;;  %1329 = vpow2.f32 %v1163_v13  ;;  %v790_v21 = vadd.f32 %v1817_v6, %v744_v16 }
 0x189   : > { %v1306_v23 = vpop.eup %1305  ;;  %v897_v24 = vadd.f32 1.0, %v1304_v18  ;;  %1331 = vpow2.f32 %v1162_v14  ;;  %v1178_v28 = vmul.f32 -1.442695, %v789_v22 }
 0x18a   : > { %v1308_v25 = vpop.eup %1307  ;;  %1025 = vst.msk [vmem:[%s1547_s7 + $0x18] sm:$0xff] %vm1021_vm3, %v1306_v23  ;;  %1333 = vrcp.f32 %v898_v19  ;;  %v1179_v26 = vmul.f32 -1.442695, %v790_v21  ;;  %v699_v32 = vpop.xlane.xlu0 %698 }
 0x18b   : > { %v1310_v29 = vpop.eup %1309  ;;  %1022 = vst.msk [vmem:[%s1547_s7] sm:$0xff] %vm1021_vm3, %v1308_v25  ;;  %1335 = vrcp.f32 %v897_v24  ;;  %v702_v31 = vpop.xlane.xlu1 %701  ;;  %v775_v27 = vadd.f32 %v1817_v6, %v699_v32 }
 0x18c   : > { %v1312_v34 = vpop.eup %1311  ;;  %v914_v38 = vadd.f32 1.0, %v1310_v29  ;;  %1337 = vpow2.f32 %v1179_v26  ;;  %v776_v20 = vadd.f32 %v1817_v6, %v702_v31 }
 0x18d   : > { %v1314_v39 = vpop.eup %1313  ;;  %v913_v40 = vadd.f32 1.0, %v1312_v34  ;;  %1339 = vpow2.f32 %v1178_v28  ;;  %v1164_v33 = vmul.f32 -1.442695, %v775_v27 }
 0x18e   : > { %v1316_v30 = vpop.eup %1315  ;;  %1041 = vst.msk [vmem:[%s1547_s7 + $0x98] sm:$0xff] %vm1021_vm3, %v1314_v39  ;;  %1341 = vrcp.f32 %v914_v38  ;;  %v1165_v37 = vmul.f32 -1.442695, %v776_v20  ;;  %v747_v47 = vpop.xlane.xlu0 %746 }
 0x18f   : > { %v1318_v45 = vpop.eup %1317  ;;  %1038 = vst.msk [vmem:[%s1547_s7 + $0x80] sm:$0xff] %vm1021_vm3, %v1316_v30  ;;  %1343 = vrcp.f32 %v913_v40  ;;  %v750_v46 = vpop.xlane.xlu1 %749  ;;  %v791_v49 = vadd.f32 %v1817_v6, %v747_v47 }
 0x190   : > { %v1320_v35 = vpop.eup %1319  ;;  %v900_v41 = vadd.f32 1.0, %v1318_v45  ;;  %1345 = vpow2.f32 %v1165_v37  ;;  %v792_v42 = vadd.f32 %v1817_v6, %v750_v46 }
 0x191   : > { %v1322_v50 = vpop.eup %1321  ;;  %v899_v36 = vadd.f32 1.0, %v1320_v35  ;;  %1347 = vpow2.f32 %v1164_v33  ;;  %v1180_v51 = vmul.f32 -1.442695, %v791_v49 }
 0x192   : > { %v1324_v43 = vpop.eup %1323  ;;  %1024 = vst.msk [vmem:[%s1547_s7 + $0x10] sm:$0xff] %vm1021_vm3, %v1322_v50  ;;  %1349 = vrcp.f32 %v900_v41  ;;  %v1181_v48 = vmul.f32 -1.442695, %v792_v42  ;;  %v705_v55 = vpop.xlane.xlu0 %704 }
 0x193   : > { %v1326_v52 = vpop.eup %1325  ;;  %1040 = vst.msk [vmem:[%s1547_s7 + $0x90] sm:$0xff] %vm1021_vm3, %v1324_v43  ;;  %1351 = vrcp.f32 %v899_v36  ;;  %v708_v54 = vpop.xlane.xlu1 %707  ;;  %v777_v58 = vadd.f32 %v1817_v6, %v705_v55 }
 0x194   : > { %v1328_v56 = vpop.eup %1327  ;;  %v916_v53 = vadd.f32 1.0, %v1326_v52  ;;  %1353 = vpow2.f32 %v1181_v48  ;;  %v778_v57 = vadd.f32 %v1817_v6, %v708_v54 }
 0x195   : > { %v1330_v59 = vpop.eup %1329  ;;  %v915_v60 = vadd.f32 1.0, %v1328_v56  ;;  %1355 = vpow2.f32 %v1180_v51  ;;  %v1166_v2 = vmul.f32 -1.442695, %v777_v58 }
 0x196   : > { %v1332_v61 = vpop.eup %1331  ;;  %1357 = vrcp.f32 %v916_v53  ;;  %v902_v62 = vadd.f32 1.0, %v1330_v59  ;;  %v1167_v63 = vmul.f32 -1.442695, %v778_v57  ;;  %v753_v4 = vpop.xlane.xlu0 %752 }
 0x197   : > { %v1334_v0 = vpop.eup %1333  ;;  %1359 = vrcp.f32 %v915_v60  ;;  %v901_v1 = vadd.f32 1.0, %v1332_v61  ;;  %v756_v3 = vpop.xlane.xlu1 %755  ;;  %v793_v8 = vadd.f32 %v1817_v6, %v753_v4 }
 0x198   : > { %v1336_v5 = vpop.eup %1335  ;;  %1027 = vst.msk [vmem:[%s1547_s7 + $0x28] sm:$0xff] %vm1021_vm3, %v1334_v0  ;;  %1361 = vrcp.f32 %v902_v62  ;;  %v794_v7 = vadd.f32 %v1817_v6, %v756_v3 }
 0x199   : > { %v1338_v9 = vpop.eup %1337  ;;  %1026 = vst.msk [vmem:[%s1547_s7 + $0x20] sm:$0xff] %vm1021_vm3, %v1336_v5  ;;  %1363 = vrcp.f32 %v901_v1  ;;  %v1182_v14 = vmul.f32 -1.442695, %v793_v8 }
 0x19a   : > { %v1340_v10 = vpop.eup %1339  ;;  %v918_v11 = vadd.f32 1.0, %v1338_v9  ;;  %1365 = vpow2.f32 %v1167_v63  ;;  %v1183_v12 = vmul.f32 -1.442695, %v794_v7  ;;  %v711_v16 = vpop.xlane.xlu0 %710 }
 0x19b   : > { %v1342_v44 = vpop.eup %1341  ;;  %v917_v13 = vadd.f32 1.0, %v1340_v10  ;;  %1367 = vpow2.f32 %v1166_v2  ;;  %v714_v15 = vpop.xlane.xlu1 %713  ;;  %v779_v19 = vadd.f32 %v1817_v6, %v711_v16 }
 0x19c   : > { %v1344_v17 = vpop.eup %1343  ;;  %1043 = vst.msk [vmem:[%s1547_s7 + $0xa8] sm:$0xff] %vm1021_vm3, %v1342_v44  ;;  %1369 = vrcp.f32 %v918_v11  ;;  %v780_v18 = vadd.f32 %v1817_v6, %v714_v15 }
 0x19d   : > { %v1346_v21 = vpop.eup %1345  ;;  %1042 = vst.msk [vmem:[%s1547_s7 + $0xa0] sm:$0xff] %vm1021_vm3, %v1344_v17  ;;  %1371 = vrcp.f32 %v917_v13  ;;  %v1168_v28 = vmul.f32 -1.442695, %v779_v19 }
 0x19e   : > { %v1348_v22 = vpop.eup %1347  ;;  %v904_v23 = vadd.f32 1.0, %v1346_v21  ;;  %1373 = vpow2.f32 %v1183_v12  ;;  %v1169_v24 = vmul.f32 -1.442695, %v780_v18  ;;  %v759_v31 = vpop.xlane.xlu0 %758 }
 0x19f   : > { %v1350_v25 = vpop.eup %1349  ;;  %v903_v26 = vadd.f32 1.0, %v1348_v22  ;;  %1375 = vpow2.f32 %v1182_v14  ;;  %v762_v29 = vpop.xlane.xlu1 %761  ;;  %v795_v38 = vadd.f32 %v1817_v6, %v759_v31 }
 0x1a0   : > { %v1352_v32 = vpop.eup %1351  ;;  %1029 = vst.msk [vmem:[%s1547_s7 + $0x38] sm:$0xff] %vm1021_vm3, %v1350_v25  ;;  %1377 = vrcp.f32 %v904_v23  ;;  %v796_v34 = vadd.f32 %v1817_v6, %v762_v29 }
 0x1a1   : > { %v1354_v20 = vpop.eup %1353  ;;  %1028 = vst.msk [vmem:[%s1547_s7 + $0x30] sm:$0xff] %vm1021_vm3, %v1352_v32  ;;  %1379 = vrcp.f32 %v903_v26  ;;  %v1184_v33 = vmul.f32 -1.442695, %v795_v38 }
 0x1a2   : > { %v1356_v27 = vpop.eup %1355  ;;  %v920_v39 = vadd.f32 1.0, %v1354_v20  ;;  %1381 = vpow2.f32 %v1169_v24  ;;  %v1185_v40 = vmul.f32 -1.442695, %v796_v34 }
 0x1a3   : > { %v1358_v30 = vpop.eup %1357  ;;  %v919_v37 = vadd.f32 1.0, %v1356_v27  ;;  %1383 = vpow2.f32 %v1168_v28 }
 0x1a4   : > { %v1360_v45 = vpop.eup %1359  ;;  %1045 = vst.msk [vmem:[%s1547_s7 + $0xb8] sm:$0xff] %vm1021_vm3, %v1358_v30  ;;  %1385 = vrcp.f32 %v920_v39 }
 0x1a5   : > { %v1362_v6 = vpop.eup %1361  ;;  %1044 = vst.msk [vmem:[%s1547_s7 + $0xb0] sm:$0xff] %vm1021_vm3, %v1360_v45  ;;  %1387 = vrcp.f32 %v919_v37 }
 0x1a6   : > { %v1364_v46 = vpop.eup %1363  ;;  %1031 = vst.msk [vmem:[%s1547_s7 + $0x48] sm:$0xff] %vm1021_vm3, %v1362_v6  ;;  %1389 = vpow2.f32 %v1185_v40 }
 0x1a7   : > { %v1366_v47 = vpop.eup %1365  ;;  %1030 = vst.msk [vmem:[%s1547_s7 + $0x40] sm:$0xff] %vm1021_vm3, %v1364_v46  ;;  %1391 = vpow2.f32 %v1184_v33 }
 0x1a8   : > { %v1368_v35 = vpop.eup %1367  ;;  %v906_v41 = vadd.f32 1.0, %v1366_v47 }
 0x1a9   : > { %v1370_v42 = vpop.eup %1369  ;;  %v905_v49 = vadd.f32 1.0, %v1368_v35 }
 0x1aa   : > { %v1372_v50 = vpop.eup %1371  ;;  %1047 = vst.msk [vmem:[%s1547_s7 + $0xc8] sm:$0xff] %vm1021_vm3, %v1370_v42  ;;  %1393 = vrcp.f32 %v906_v41 }
 0x1ab   : > { %v1374_v36 = vpop.eup %1373  ;;  %1046 = vst.msk [vmem:[%s1547_s7 + $0xc0] sm:$0xff] %vm1021_vm3, %v1372_v50  ;;  %1395 = vrcp.f32 %v905_v49 }
 0x1ac   : > { %v1376_v43 = vpop.eup %1375  ;;  %v922_v48 = vadd.f32 1.0, %v1374_v36 }
 0x1ad   : > { %v1378_v51 = vpop.eup %1377  ;;  %v921_v52 = vadd.f32 1.0, %v1376_v43 }
 0x1ae   : > { %v1380_v54 = vpop.eup %1379  ;;  %1033 = vst.msk [vmem:[%s1547_s7 + $0x58] sm:$0xff] %vm1021_vm3, %v1378_v51  ;;  %1397 = vrcp.f32 %v922_v48 }
 0x1af   : > { %v1382_v55 = vpop.eup %1381  ;;  %1032 = vst.msk [vmem:[%s1547_s7 + $0x50] sm:$0xff] %vm1021_vm3, %v1380_v54  ;;  %1399 = vrcp.f32 %v921_v52 }
 0x1b0   : > { %v1384_v56 = vpop.eup %1383  ;;  %v908_v53 = vadd.f32 1.0, %v1382_v55 }
 0x1b1   : > { %v1386_v57 = vpop.eup %1385  ;;  %v907_v58 = vadd.f32 1.0, %v1384_v56 }
 0x1b2   : > { %v1388_v59 = vpop.eup %1387  ;;  %1049 = vst.msk [vmem:[%s1547_s7 + $0xd8] sm:$0xff] %vm1021_vm3, %v1386_v57  ;;  %1401 = vrcp.f32 %v908_v53 }
 0x1b3   : > { %v1390_v60 = vpop.eup %1389  ;;  %1048 = vst.msk [vmem:[%s1547_s7 + $0xd0] sm:$0xff] %vm1021_vm3, %v1388_v59  ;;  %1403 = vrcp.f32 %v907_v58 }
 0x1b4   : > { %v1392_v61 = vpop.eup %1391  ;;  %v924_v62 = vadd.f32 1.0, %v1390_v60 }
 0x1b5   : > { %v923_v63 = vadd.f32 1.0, %v1392_v61 }
 0x1b6   : > { %1405 = vrcp.f32 %v924_v62 }
 0x1b7   : > { %v1394_v0 = vpop.eup %1393  ;;  %1407 = vrcp.f32 %v923_v63 }
 0x1b8   : > { %v1396_v1 = vpop.eup %1395  ;;  %1035 = vst.msk [vmem:[%s1547_s7 + $0x68] sm:$0xff] %vm1021_vm3, %v1394_v0 }
 0x1b9   : > { %1034 = vst.msk [vmem:[%s1547_s7 + $0x60] sm:$0xff] %vm1021_vm3, %v1396_v1 }
 0x1bb   : > { %v1398_v2 = vpop.eup %1397 }
 0x1bc   : > { %v1400_v3 = vpop.eup %1399  ;;  %1051 = vst.msk [vmem:[%s1547_s7 + $0xe8] sm:$0xff] %vm1021_vm3, %v1398_v2 }
 0x1bd   : > { %1050 = vst.msk [vmem:[%s1547_s7 + $0xe0] sm:$0xff] %vm1021_vm3, %v1400_v3 }
 0x1bf   : > { %v1402_v4 = vpop.eup %1401 }
 0x1c0   : > { %v1404_v5 = vpop.eup %1403  ;;  %1037 = vst.msk [vmem:[%s1547_s7 + $0x78] sm:$0xff] %vm1021_vm3, %v1402_v4 }
 0x1c1   : > { %1036 = vst.msk [vmem:[%s1547_s7 + $0x70] sm:$0xff] %vm1021_vm3, %v1404_v5 }
 0x1c3   : > { %v1406_v7 = vpop.eup %1405 }
 0x1c4   : > { %v1408_v8 = vpop.eup %1407  ;;  %1053 = vst.msk [vmem:[%s1547_s7 + $0xf8] sm:$0xff] %vm1021_vm3, %v1406_v7 }
 0x1c5   : > { %1052 = vst.msk [vmem:[%s1547_s7 + $0xf0] sm:$0xff] %vm1021_vm3, %v1408_v8 }
 0x1c6 PF: > { %s16_s20 = sadd.s32 1, %s1415_s20  }
 0x1c7   : > { %p13_p4 = scmp.ge.s32.totalorder %s16_s20, 4  }
 0x1c9   :  { %15 = sbr.rel (!%p13_p4) target bundleno = 2 (0x2), region = 70 }

</bundles_post_ra>
